<compile_context>
chip_gen: v5e
topology: v5e:2x2
jax: 0.10.0
libtpu: 0.0.40
codegen_flags: <defaults>
</compile_context>

<pallas_src>
import jax
import jax.numpy as jnp
from jax.experimental import pallas as pl
from jax.experimental.pallas import tpu as pltpu


def _concat_proj_kernel(x_ref, w_ref, b_ref, o_ref):
    # x_ref: [tm, Dsum]   (matmul dtype, bf16 by default)
    # w_ref: [Dsum, tn]   (matmul dtype, transposed weight slice)
    # b_ref: [1, tn]      (fp32)
    # o_ref: [tm, tn]
    acc = jnp.dot(x_ref[...], w_ref[...], preferred_element_type=jnp.float32)
    o_ref[...] = (acc + b_ref[...]).astype(o_ref.dtype)


def _round_up(x, m):
    return (x + m - 1) // m * m


def concat_strategy_forward(unprojected_outs, weight, bias, *,
                            tile_m=1024, tile_n=2048,
                            matmul_dtype=jnp.bfloat16,
                            out_dtype=None,
                            vmem_budget_bytes=44 * 1024 * 1024):
    """JAX wrapper for ConcatStrategy.forward (no vocab reduction).

    Args:
      unprojected_outs: list of arrays [B, T, D_i] (one per decoder).
      weight: [V, sum(D_i)]  (PyTorch nn.Linear convention).
      bias:   [V].
      tile_m, tile_n: requested tile sizes for the (B*T) and vocab axes;
        clamped automatically for small shapes / VMEM budget.
      matmul_dtype: dtype of the MXU operands (accumulation is always fp32,
        bias add is fp32).  bf16 default; pass jnp.float32 for exact fp32.
      out_dtype: logits dtype; defaults to the input activation dtype.
      vmem_budget_bytes: cap on the double-buffered VMEM tile footprint
        (keeps the kernel valid on v7x's 64 MiB per-TC VMEM).
    Returns:
      (logits [B, T, V], possible_translation_tokens=None)
    """
    B, T = unprojected_outs[0].shape[:2]
    M = B * T
    V, Dsum_w = weight.shape

    out_dtype = unprojected_outs[0].dtype if out_dtype is None else out_dtype
    in_dtype = jnp.dtype(matmul_dtype)
    in_itemsize = in_dtype.itemsize
    out_itemsize = jnp.dtype(out_dtype).itemsize

    # Feature-axis concat done once in the wrapper (single K=Dsum matmul in
    # the kernel); cast pieces directly to the matmul dtype so only one copy
    # of the activations is materialized in that dtype.
    pieces = [x.reshape(M, x.shape[-1]).astype(in_dtype)
              for x in unprojected_outs]
    x_cat = jnp.concatenate(pieces, axis=1)
    Dsum = x_cat.shape[1]
    assert Dsum == Dsum_w, (weight.shape, Dsum)

    # Sublane granularity of the matmul-operand dtype (bf16 packs 16 rows).
    sub = 16 if in_itemsize == 2 else 8

    tm = max(sub, _round_up(min(tile_m, _round_up(M, sub)), sub))
    tn = max(128, _round_up(min(tile_n, _round_up(V, 128)), 128))

    def _footprint(tm_, tn_):
        # double-buffered x + W tiles, bias tile, double-buffered out tile
        return (2 * (tm_ * Dsum + Dsum * tn_) * in_itemsize
                + 2 * tn_ * 4
                + 2 * tm_ * tn_ * out_itemsize)

    # Clamp tiles so the double-buffered footprint fits the VMEM budget.
    while _footprint(tm, tn) > vmem_budget_bytes:
        if tm > sub and tm >= tn:
            tm = max(sub, _round_up(tm // 2, sub))
        elif tn > 128:
            tn = max(128, _round_up(tn // 2, 128))
        elif tm > sub:
            tm = max(sub, _round_up(tm // 2, sub))
        else:
            break

    M_pad = _round_up(M, tm)
    V_pad = _round_up(V, tn)

    if M_pad != M:
        x_cat = jnp.pad(x_cat, ((0, M_pad - M), (0, 0)))

    w_t = weight.T.astype(in_dtype)                 # [Dsum, V]
    b_2d = bias.astype(jnp.float32).reshape(1, V)   # fp32 bias add
    if V_pad != V:
        w_t = jnp.pad(w_t, ((0, 0), (0, V_pad - V)))
        b_2d = jnp.pad(b_2d, ((0, 0), (0, V_pad - V)))

    m_tiles = M_pad // tm
    v_tiles = V_pad // tn

    x_bytes = M_pad * Dsum * in_itemsize
    w_bytes = Dsum * V_pad * in_itemsize
    b_bytes = V_pad * 4
    out_bytes = M_pad * V_pad * out_itemsize

    # The operand whose BlockSpec depends on the *inner* grid axis is
    # re-streamed once per outer tile.  Pick the order minimizing HBM traffic:
    #   "mv": grid=(m_tiles, v_tiles) -> W (+bias) re-read m_tiles times
    #   "vm": grid=(v_tiles, m_tiles) -> x re-read v_tiles times
    traffic_mv = w_bytes * m_tiles + b_bytes * m_tiles + x_bytes
    traffic_vm = x_bytes * v_tiles + w_bytes + b_bytes

    if traffic_mv <= traffic_vm:
        grid = (m_tiles, v_tiles)
        x_spec = pl.BlockSpec((tm, Dsum), lambda i, j: (i, 0))
        w_spec = pl.BlockSpec((Dsum, tn), lambda i, j: (0, j))
        b_spec = pl.BlockSpec((1, tn), lambda i, j: (0, j))
        o_spec = pl.BlockSpec((tm, tn), lambda i, j: (i, j))
        bytes_accessed = traffic_mv + out_bytes
    else:
        grid = (v_tiles, m_tiles)
        x_spec = pl.BlockSpec((tm, Dsum), lambda j, i: (i, 0))
        w_spec = pl.BlockSpec((Dsum, tn), lambda j, i: (0, j))
        b_spec = pl.BlockSpec((1, tn), lambda j, i: (0, j))
        o_spec = pl.BlockSpec((tm, tn), lambda j, i: (i, j))
        bytes_accessed = traffic_vm + out_bytes

    cost = pl.CostEstimate(
        flops=2 * M_pad * Dsum * V_pad,
        transcendentals=0,
        bytes_accessed=int(bytes_accessed))

    vmem_limit = int(min(max(_footprint(tm, tn) * 5 // 4, 8 * 1024 * 1024),
                         96 * 1024 * 1024))

    logits_2d = pl.pallas_call(
        _concat_proj_kernel,
        out_shape=jax.ShapeDtypeStruct((M_pad, V_pad), out_dtype),
        grid_spec=pltpu.PrefetchScalarGridSpec(
            num_scalar_prefetch=0,
            grid=grid,
            in_specs=[x_spec, w_spec, b_spec],
            out_specs=o_spec,
        ),
        compiler_params=pltpu.CompilerParams(
            dimension_semantics=("parallel", "parallel"),
            vmem_limit_bytes=vmem_limit),
        cost_estimate=cost,
    )(x_cat, w_t, b_2d)

    logits = logits_2d[:M, :V].reshape(B, T, V)
    return logits, None


if __name__ == "__main__":
    # Small shapes consistent with the module's forward:
    #   two decoders with out_embed_dims = (16, 32), vocab_size = 256
    B, T = 2, 8
    out_embed_dims = (16, 32)
    vocab_size = 256

    key = jax.random.PRNGKey(0)
    k1, k2, kw, kb = jax.random.split(key, 4)

    x1 = jax.random.normal(k1, (B, T, out_embed_dims[0]), dtype=jnp.float32)
    x2 = jax.random.normal(k2, (B, T, out_embed_dims[1]), dtype=jnp.float32)

    Dsum = sum(out_embed_dims)
    scale = 1.0 / jnp.sqrt(jnp.float32(Dsum))
    weight = jax.random.uniform(kw, (vocab_size, Dsum), dtype=jnp.float32,
                                minval=-scale, maxval=scale)
    bias = jax.random.uniform(kb, (vocab_size,), dtype=jnp.float32,
                              minval=-scale, maxval=scale)

    # Reference: plain JAX concat + affine projection (fp32).
    x_cat = jnp.concatenate([x1, x2], axis=2)
    ref = jnp.einsum("btd,vd->btv", x_cat, weight) + bias

    # Default (bf16 operands, fp32 accumulation + bias): biggest perf lever.
    logits, ptt = concat_strategy_forward([x1, x2], weight, bias)
    logits = jax.block_until_ready(logits)
    assert logits.shape == (B, T, vocab_size)
    assert ptt is None
    assert jnp.allclose(logits, ref, atol=2e-2, rtol=2e-2)

    # Exact-fp32 path keeps the original module's numerics bit-for-bit close.
    logits_f32, _ = concat_strategy_forward([x1, x2], weight, bias,
                                            matmul_dtype=jnp.float32)
    logits_f32 = jax.block_until_ready(logits_f32)
    assert jnp.allclose(logits_f32, ref, atol=1e-4, rtol=1e-4)

    print("KERNEL_OK")
</pallas_src>

<mosaic_0001>
module attributes {stable_mosaic.version = 11 : i64} {
  func.func @_concat_proj_kernel(%arg0: i32, %arg1: i32, %arg2: memref<16x48xbf16, #tpu.memory_space<vmem>>, %arg3: memref<48x256xbf16, #tpu.memory_space<vmem>>, %arg4: memref<1x256xf32, #tpu.memory_space<vmem>>, %arg5: memref<16x256xf32, #tpu.memory_space<vmem>>) attributes {dimension_semantics = [#tpu.dimension_semantics<parallel>, #tpu.dimension_semantics<parallel>], iteration_bounds = array<i64: 1, 1>, scalar_prefetch = 0 : i64, scratch_operands = 0 : i64, tpu.core_type = #tpu.core_type<tc>, window_params = [{transform_indices = @transform_0, window_bounds = array<i64: 16, 48>}, {transform_indices = @transform_1, window_bounds = array<i64: 48, 256>}, {transform_indices = @transform_2, window_bounds = array<i64: 1, 256>}, {transform_indices = @transform_3, window_bounds = array<i64: 16, 256>}]} {
    %c0 = arith.constant 0 : index
    %c0_0 = arith.constant 0 : index
    %0 = vector.load %arg2[%c0, %c0_0] : memref<16x48xbf16, #tpu.memory_space<vmem>>, vector<16x48xbf16>
    %c0_1 = arith.constant 0 : index
    %c0_2 = arith.constant 0 : index
    %1 = vector.load %arg3[%c0_1, %c0_2] : memref<48x256xbf16, #tpu.memory_space<vmem>>, vector<48x256xbf16>
    %cst = arith.constant dense<0.000000e+00> : vector<16x256xf32>
    %2 = tpu.matmul %0, %1, %cst {dimension_numbers = #tpu.dot_dimension_numbers<[1], [0], [0], [1], [0, 0, 1, 1], [], []>} : vector<16x48xbf16>, vector<48x256xbf16>, vector<16x256xf32> -> vector<16x256xf32>
    %c0_3 = arith.constant 0 : index
    %c0_4 = arith.constant 0 : index
    %3 = vector.load %arg4[%c0_3, %c0_4] : memref<1x256xf32, #tpu.memory_space<vmem>>, vector<1x256xf32>
    %4 = vector.broadcast %3 : vector<1x256xf32> to vector<16x256xf32>
    %5 = arith.addf %2, %4 : vector<16x256xf32>
    %c0_5 = arith.constant 0 : index
    %c0_6 = arith.constant 0 : index
    %6 = vector.load %arg5[%c0_5, %c0_6] : memref<16x256xf32, #tpu.memory_space<vmem>>, vector<16x256xf32>
    tpu.vector_store %arg5[%c0_5, %c0_6], %5 {strides = array<i32>} : memref<16x256xf32, #tpu.memory_space<vmem>>, vector<16x256xf32>,
    return
  }
  func.func @transform_0(%arg0: i32, %arg1: i32) -> (i32, i32) {
    %c0_i32 = arith.constant 0 : i32
    %c0_i32_0 = arith.constant 0 : i32
    return %arg0, %c0_i32 : i32, i32
  }
  func.func @transform_1(%arg0: i32, %arg1: i32) -> (i32, i32) {
    %c0_i32 = arith.constant 0 : i32
    %c0_i32_0 = arith.constant 0 : i32
    return %c0_i32, %arg1 : i32, i32
  }
  func.func @transform_2(%arg0: i32, %arg1: i32) -> (i32, i32) {
    %c0_i32 = arith.constant 0 : i32
    %c0_i32_0 = arith.constant 0 : i32
    return %c0_i32, %arg1 : i32, i32
  }
  func.func @transform_3(%arg0: i32, %arg1: i32) -> (i32, i32) {
    %c0_i32 = arith.constant 0 : i32
    return %arg0, %arg1 : i32, i32
  }
}

</mosaic_0001>

<bundles_post_ra>
// kernel: tpu_custom_call.1
= control target key start
LH: loop header
LB: loop body
LE: loop exit
PB: predicated region body
PF: predicated region fallthrough
CT: control target
= control target key end

     0   :  { %8 = vsyncpa [#allocation3], 0  ;;  %s357_s0 = inlined_call_operand.hbm [shape: bf16[16,48], index: 0, kind: input, shape index: {}]   ;;  %s358_s1 = inlined_call_operand.hbm [shape: bf16[48,256], index: 1, kind: input, shape index: {}]   ;;  %s359_s2 = inlined_call_operand.hbm [shape: f32[1,256], index: 2, kind: input, shape index: {}]   ;;  %s360_s3 = inlined_call_operand.hbm [shape: f32[16,256], index: 3, kind: output, shape index: {}]  }
   0x1   :  { %9 = vsyncpa [#allocation6], 0  ;;  %s28_s14 = sshll.u32 %s358_s1, 4  ;;  %s29_s14 = int_to_ptr.hbm [resolvable:$true] %s28_s14 }
   0x2   :  { %10 = vsyncpa [#allocation4], 0  ;;  %s315_s15 = smov [#allocation5]   ;;  %s15_s19 = sshll.u32 %s357_s0, 4  ;;  %s16_s19 = int_to_ptr.hbm [resolvable:$true] %s15_s19 }
   0x3   :  { %s30_s16 = sshll.u32 %s315_s15, 4  ;;  %s316_s20 = smov 128   ;;  %s31_s16 = int_to_ptr.vmem [resolvable:$true] %s30_s16 }
   0x4   :  { %s317_s21 = smov 8   ;;  %s318_s22 = smov [#allocation2]  }
   0x5   :  { %36 = dma.hbm_to_vmem [thread:$0]  %s29_s14, 768, %s31_s16, [#allocation6], %s316_s20, %s316_s20, %s317_s21  }
   0x6   :  { %s17_s23 = sshll.u32 %s318_s22, 4  ;;  %s319_s24 = smov 64   ;;  %s18_s23 = int_to_ptr.vmem [resolvable:$true] %s17_s23 }
   0x7   :  { %s320_s25 = smov 4   ;;  %s42_s27 = sshll.u32 %s359_s2, 4  ;;  %s43_s27 = int_to_ptr.hbm [resolvable:$true] %s42_s27 }
   0x8   :  { %23 = dma.hbm_to_vmem [thread:$0]  %s16_s19, 128, %s18_s23, [#allocation3], %s319_s24, %s319_s24, %s320_s25  }
   0x9   :  { %s321_s28 = smov [#allocation7]  }
   0xa   :  { %s44_s29 = sshll.u32 %s321_s28, 4  ;;  %s45_s29 = int_to_ptr.vmem [resolvable:$true] %s44_s29 }
   0xb   :  { %47 = dma.hbm_to_vmem [thread:$0]  %s43_s27, 32, %s45_s29, [#allocation6]  }
   0xc   :  { %309 = dma.done.wait [#allocation3], 128  }
   0xd   :  { %310 = vsyncadd [#allocation3], 4294967168 }
   0xe   :  { %311 = dma.done.wait [#allocation6], 800  }
   0xf   :  { %312 = vsyncadd [#allocation6], 4294966496  ;;  %v188_v0 = vld [vmem:[#allocation5 + $0x20] sm:$0xf]  ;;  %v202_v1 = vld [vmem:[#allocation5 + $0x24] sm:$0xf0] }
  0x10   :  { %v201_v2 = vld [vmem:[#allocation5 + $0x24] sm:$0xf]  ;;  %v189_v3 = vor.u32 %v202_v1, %v188_v0  ;;  %v190_v4 = vld [vmem:[#allocation5 + $0x28] sm:$0xf0]  ;;  %v180_v5 = vld [vmem:[#allocation5 + $0x10] sm:$0xf] }
  0x11   :  { %v200_v6 = vld [vmem:[#allocation5 + $0x14] sm:$0xf0]  ;;  %v193_v7 = vor.u32 %v201_v2, %v190_v4  ;;  %v199_v8 = vld [vmem:[#allocation5 + $0x14] sm:$0xf]  ;;  %v182_v9 = vld [vmem:[#allocation5 + $0x18] sm:$0xf0] }
  0x12   :  { %119 = vmatpush.bf16.msra.mxu0 %v189_v3  ;;  %v181_v10 = vor.u32 %v200_v6, %v180_v5  ;;  %v185_v11 = vor.u32 %v199_v8, %v182_v9  ;;  %v172_v12 = vld [vmem:[#allocation5] sm:$0xf]  ;;  %v198_v13 = vld [vmem:[#allocation5 + $0x4] sm:$0xf0]  ;;  %v197_v14 = vld [vmem:[#allocation5 + $0x4] sm:$0xf] }
  0x13   :  { %133 = vmatpush.bf16.msra.mxu1 %v193_v7  ;;  %v174_v15 = vld [vmem:[#allocation5 + $0x8] sm:$0xf0]  ;;  %v173_v16 = vor.u32 %v198_v13, %v172_v12  ;;  %v196_v18 = vld [vmem:[#allocation2] sm:$0xff]  ;;  %vm110_vm0 = vcmask 392192   ;;  %v69_v19 = vld [vmem:[#allocation7] sm:$0x3] }
  0x14   :  { %v177_v17 = vor.u32 %v197_v14, %v174_v15  ;;  %v71_v20 = vperm.slane %v69_v19, 0  ;;  %v72_v21 = vperm.slane %v69_v19, 1  ;;  %s322_s0 = smov [#allocation8]   ;;  %s152_s5 = sshll.u32 %s360_s3, 4  ;;  %s153_s5 = int_to_ptr.hbm [resolvable:$true] %s152_s5 }
  0x15   :  { %s150_s2 = sshll.u32 %s322_s0, 4  ;;  %s323_s6 = smov 256   ;;  %s151_s2 = int_to_ptr.vmem [resolvable:$true] %s150_s2 }
  0x16   :  { %120 = vmatpush.bf16.msra.mxu0 %v181_v10  ;;  %s324_s7 = smov 16  }
  0x17   :  { %134 = vmatpush.bf16.msra.mxu1 %v185_v11 }
  0x1a   :  { %121 = vmatpush.bf16.msra.mxu0 %v173_v16 }
  0x1b   :  { %135 = vmatpush.bf16.msra.mxu1 %v177_v17 }
  0x1d   :  { %194 = vmatmul.msk.bf16.vlgmr.msra.gmra.mxu0 %vm110_vm0, %v196_v18 }
  0x1e   :  { %195 = vmatmul.msk.bf16.vlgmr.msra.gmra.mxu1 %vm110_vm0, %v196_v18 }
  0x9a   :  { %v123_v22 = vpop.f32.mrf.mxu0 }
  0x9b   :  { %v124_v23 = vadd.f32 %v123_v22, %v71_v20  ;;  %v137_v24 = vpop.f32.mrf.mxu1 }
  0x9c   :  { %v138_v25 = vadd.f32 %v137_v24, %v72_v21 }
  0x9d   :  { %142 = vst [vmem:[#allocation8] sm:$0xff] %v124_v23 }
  0x9e   :  { %143 = vst [vmem:[#allocation8 + $0x8] sm:$0xff] %v138_v25 }
  0xa2   :  { %v125_v26 = vpop.f32.mrf.mxu0 }
  0xa3   :  { %v126_v27 = vadd.f32 %v125_v26, %v71_v20  ;;  %v139_v28 = vpop.f32.mrf.mxu1 }
  0xa4   :  { %v140_v29 = vadd.f32 %v139_v28, %v72_v21 }
  0xa5   :  { %144 = vst [vmem:[#allocation8 + $0x10] sm:$0xff] %v126_v27 }
  0xa6   :  { %145 = vst [vmem:[#allocation8 + $0x18] sm:$0xff] %v140_v29 }
  0xa7   :  { %158 = dma.vmem_to_hbm [thread:$0]  %s151_s2, 512, %s153_s5, [#allocation4], %s323_s6, %s323_s6, %s324_s7  }
  0xa8   :  { %313 = dma.done.wait [#allocation4], 512  }
  0xa9   :  { %314 = vsyncadd [#allocation4], 4294966784 }
  0xaa   :  { %163 = vsyncpa [#allocation3], 1 }
  0xab   :  { %164 = vsyncpa [#allocation6], 1 }
  0xac   :  { %165 = vsyncpa [#allocation4], 1 }

</bundles_post_ra>
